<compile_context>
chip_gen: v7x
topology: tpu7x:2x2x1
jax: 0.10.0
libtpu: 0.0.40
codegen_flags: <defaults>
</compile_context>

<pallas_src>
import jax
import jax.numpy as jnp
from jax import lax
from jax.experimental import pallas as pl
from jax.experimental.pallas import tpu as pltpu


def _round_up(x, m):
    return ((x + m - 1) // m) * m


def _sample_weight_kernel(r_ref, t_ref, z_ref, w_r_ref, wtzb_ref, o_ref):
    """Fused concat + Linear(n_hgcn+2, 1), lane-dense output.

    r_ref    : (TILE_N, H)  activations tile                 (VMEM)
    t_ref    : (1, TILE_N)  t values, lane-dense             (VMEM)
    z_ref    : (1, TILE_N)  z values, lane-dense             (VMEM)
    w_r_ref  : (1, H)       Linear weight for the r columns  (VMEM, resident)
    wtzb_ref : (3,)         [w_t, w_z, bias] scalars         (SMEM)
    o_ref    : (1, TILE_N)  lane-dense output tile           (VMEM)
    """
    r = r_ref[...]                                    # (TILE_N, H), native dtype
    w_row = w_r_ref[...].astype(r.dtype)              # (1, H)

    # (1, H) x (TILE_N, H), contracting H -> (1, TILE_N): keeps the output
    # lane-dense and the streamed/moving MXU side tiny (M=1).
    acc = lax.dot_general(
        w_row, r,
        dimension_numbers=(((1,), (1,)), ((), ())),
        preferred_element_type=jnp.float32)           # (1, TILE_N) f32

    t = t_ref[...].astype(jnp.float32)                # (1, TILE_N)
    z = z_ref[...].astype(jnp.float32)
    w_t = wtzb_ref[0]                                 # SMEM scalars
    w_z = wtzb_ref[1]
    b = wtzb_ref[2]

    o_ref[...] = (acc + t * w_t + z * w_z + b).astype(o_ref.dtype)


def sample_weight_forward(r, t, z, weight, bias, *, tile_n=65536):
    """r: (N, n_hgcn), t: (N,) or (N,1), z: (N,) or (N,1).

    weight: torch-layout Linear weight of shape (1, n_hgcn+2)
    bias:   shape (1,)
    Returns (N, 1) float32.
    """
    n, n_hgcn = r.shape

    # Free reshapes of contiguous arrays -> lane-dense (1, N) side inputs.
    t_row = jnp.reshape(t, (1, n))
    z_row = jnp.reshape(z, (1, n))

    # Split the torch-layout (1, H+2) weight: (1, H) matmul part + 3 scalars.
    w_full = jnp.reshape(weight, (1, n_hgcn + 2)).astype(jnp.float32)
    w_r = w_full[:, :n_hgcn]                                    # (1, H) -> VMEM
    wtzb = jnp.concatenate(
        [w_full[0, n_hgcn:],                                    # [w_t, w_z]
         jnp.reshape(bias, (1,)).astype(jnp.float32)])          # + [b] -> SMEM

    # --- Tile sizing (VMEM-budget driven, v7x-safe) -------------------------
    r_item = jnp.dtype(r.dtype).itemsize
    t_item = jnp.dtype(t_row.dtype).itemsize
    z_item = jnp.dtype(z_row.dtype).itemsize
    lane_h = _round_up(n_hgcn, 128)                   # VMEM lane padding of r
    vmem_per_row = (2 * lane_h * r_item               # r tile, double buffered
                    + 2 * 8 * (t_item + z_item)       # t, z (1, tile) blocks
                    + 2 * 8 * 4)                      # out (1, tile) f32 block
    vmem_budget = 40 * 1024 * 1024                    # fits v7x 64 MiB VMEM
    max_tile = max(128, (vmem_budget // vmem_per_row) // 128 * 128)

    tile_n = min(tile_n, max_tile, _round_up(n, 128))
    if n > 2 * 128:
        # Ensure >= 2 grid steps so ("parallel",) can use both v7x TCs.
        tile_n = min(tile_n, _round_up(pl.cdiv(n, 2), 128))
    tile_n = max(128, tile_n)
    grid = (pl.cdiv(n, tile_n),)

    # Scoped-VMEM limit: chosen blocks + resident weight block + slack.
    vmem_limit = vmem_per_row * tile_n + 2 * 8 * lane_h * 4 + (4 << 20)
    vmem_limit = int(min(max(vmem_limit, 32 << 20), 60 << 20))

    out = pl.pallas_call(
        _sample_weight_kernel,
        out_shape=jax.ShapeDtypeStruct((1, n), jnp.float32),
        grid=grid,
        in_specs=[
            pl.BlockSpec((tile_n, n_hgcn), lambda i: (i, 0)),   # r row tile
            pl.BlockSpec((1, tile_n), lambda i: (0, i)),        # t tile
            pl.BlockSpec((1, tile_n), lambda i: (0, i)),        # z tile
            pl.BlockSpec((1, n_hgcn), lambda i: (0, 0)),        # w_r (resident)
            pl.BlockSpec(memory_space=pltpu.MemorySpace.SMEM),  # scalars
        ],
        out_specs=pl.BlockSpec((1, tile_n), lambda i: (0, i)),  # lane-dense out
        compiler_params=pltpu.CompilerParams(
            dimension_semantics=("parallel",),
            vmem_limit_bytes=vmem_limit),
        cost_estimate=pl.CostEstimate(
            flops=2 * n * (n_hgcn + 2),
            transcendentals=0,
            bytes_accessed=(n * n_hgcn * r_item + n * (t_item + z_item)
                            + n * 4 + (n_hgcn + 3) * 4)),
    )(r, t_row, z_row, w_r, wtzb)

    # (1, N) lane-dense slab -> (N, 1) (free reshape), as the torch module returns.
    return jnp.reshape(out, (n, 1))


def init_params(key, n_hgcn):
    """Deterministic init mimicking torch.nn.Linear(n_hgcn+2, 1) default
    (uniform(-1/sqrt(fan_in), 1/sqrt(fan_in)))."""
    fan_in = n_hgcn + 2
    bound = 1.0 / jnp.sqrt(jnp.float32(fan_in))
    kw, kb = jax.random.split(key)
    weight = jax.random.uniform(kw, (1, fan_in), jnp.float32, -bound, bound)
    bias = jax.random.uniform(kb, (1,), jnp.float32, -bound, bound)
    return weight, bias


if __name__ == "__main__":
    key = jax.random.PRNGKey(0)
    k_r, k_t, k_z, k_p = jax.random.split(key, 4)

    n_hgcn = 32
    batch = 8

    r = jax.random.normal(k_r, (batch, n_hgcn), jnp.float32)
    t = jax.random.normal(k_t, (batch,), jnp.float32)
    z = jax.random.normal(k_z, (batch,), jnp.float32)

    weight, bias = init_params(k_p, n_hgcn)

    out = sample_weight_forward(r, t, z, weight, bias)
    out = jax.block_until_ready(out)

    # Pure-JAX reference of the PyTorch forward.
    features = jnp.concatenate(
        [r, jnp.reshape(t, (-1, 1)), jnp.reshape(z, (-1, 1))], axis=1)
    ref = features @ weight.T + bias

    assert out.shape == (batch, 1)
    assert jnp.allclose(out, ref, atol=1e-5, rtol=1e-5)

    print("KERNEL_OK")
</pallas_src>

<mosaic_0001>
module attributes {stable_mosaic.version = 11 : i64} {
  func.func @_sample_weight_kernel(%arg0: i32, %arg1: memref<128x32xf32, #tpu.memory_space<vmem>>, %arg2: memref<1x128xf32, #tpu.memory_space<vmem>>, %arg3: memref<1x128xf32, #tpu.memory_space<vmem>>, %arg4: memref<1x32xf32, #tpu.memory_space<vmem>>, %arg5: memref<3xf32, #tpu.memory_space<smem>>, %arg6: memref<1x128xf32, #tpu.memory_space<vmem>>) attributes {dimension_semantics = [#tpu.dimension_semantics<parallel>], iteration_bounds = array<i64: 1>, scalar_prefetch = 0 : i64, scratch_operands = 0 : i64, tpu.core_type = #tpu.core_type<tc>, window_params = [{transform_indices = @transform_0, window_bounds = array<i64: 128, 32>}, {transform_indices = @transform_1, window_bounds = array<i64: 1, 128>}, {transform_indices = @transform_2, window_bounds = array<i64: 1, 128>}, {pipeline_mode = #tpu.pipeline_mode<synchronous>, transform_indices = @transform_3, window_bounds = array<i64: 1, 32>}, {transform_indices = @transform_4, window_bounds = array<i64: 3>}, {transform_indices = @transform_5, window_bounds = array<i64: 1, 128>}]} {
    %c0 = arith.constant 0 : index
    %c0_0 = arith.constant 0 : index
    %0 = vector.load %arg1[%c0, %c0_0] : memref<128x32xf32, #tpu.memory_space<vmem>>, vector<128x32xf32>
    %c0_1 = arith.constant 0 : index
    %c0_2 = arith.constant 0 : index
    %1 = vector.load %arg4[%c0_1, %c0_2] : memref<1x32xf32, #tpu.memory_space<vmem>>, vector<1x32xf32>
    %cst = arith.constant dense<0.000000e+00> : vector<1x128xf32>
    %2 = tpu.matmul %1, %0, %cst {dimension_numbers = #tpu.dot_dimension_numbers<[1], [1], [0], [0], [0, 0, 1, 0], [], []>} : vector<1x32xf32>, vector<128x32xf32>, vector<1x128xf32> -> vector<1x128xf32>
    %c0_3 = arith.constant 0 : index
    %c0_4 = arith.constant 0 : index
    %3 = vector.load %arg2[%c0_3, %c0_4] : memref<1x128xf32, #tpu.memory_space<vmem>>, vector<1x128xf32>
    %c0_5 = arith.constant 0 : index
    %c0_6 = arith.constant 0 : index
    %4 = vector.load %arg3[%c0_5, %c0_6] : memref<1x128xf32, #tpu.memory_space<vmem>>, vector<1x128xf32>
    %c0_7 = arith.constant 0 : index
    %5 = memref.load %arg5[%c0_7] : memref<3xf32, #tpu.memory_space<smem>>
    %c1 = arith.constant 1 : index
    %6 = memref.load %arg5[%c1] : memref<3xf32, #tpu.memory_space<smem>>
    %c2 = arith.constant 2 : index
    %7 = memref.load %arg5[%c2] : memref<3xf32, #tpu.memory_space<smem>>
    %8 = vector.broadcast %5 : f32 to vector<1x128xf32>
    %9 = arith.mulf %3, %8 : vector<1x128xf32>
    %10 = arith.addf %2, %9 : vector<1x128xf32>
    %11 = vector.broadcast %6 : f32 to vector<1x128xf32>
    %12 = arith.mulf %4, %11 : vector<1x128xf32>
    %13 = arith.addf %10, %12 : vector<1x128xf32>
    %14 = vector.broadcast %7 : f32 to vector<1x128xf32>
    %15 = arith.addf %13, %14 : vector<1x128xf32>
    %c0_8 = arith.constant 0 : index
    %c0_9 = arith.constant 0 : index
    %16 = vector.load %arg6[%c0_8, %c0_9] : memref<1x128xf32, #tpu.memory_space<vmem>>, vector<1x128xf32>
    tpu.vector_store %arg6[%c0_8, %c0_9], %15 {strides = array<i32>} : memref<1x128xf32, #tpu.memory_space<vmem>>, vector<1x128xf32>,
    return
  }
  func.func @transform_0(%arg0: i32) -> (i32, i32) {
    %c0_i32 = arith.constant 0 : i32
    %c0_i32_0 = arith.constant 0 : i32
    return %arg0, %c0_i32 : i32, i32
  }
  func.func @transform_1(%arg0: i32) -> (i32, i32) {
    %c0_i32 = arith.constant 0 : i32
    %c0_i32_0 = arith.constant 0 : i32
    return %c0_i32, %arg0 : i32, i32
  }
  func.func @transform_2(%arg0: i32) -> (i32, i32) {
    %c0_i32 = arith.constant 0 : i32
    %c0_i32_0 = arith.constant 0 : i32
    return %c0_i32, %arg0 : i32, i32
  }
  func.func @transform_3(%arg0: i32) -> (i32, i32) {
    %c0_i32 = arith.constant 0 : i32
    %c0_i32_0 = arith.constant 0 : i32
    %c0_i32_1 = arith.constant 0 : i32
    return %c0_i32, %c0_i32_0 : i32, i32
  }
  func.func @transform_4(%arg0: i32) -> i32 {
    %c0_i32 = arith.constant 0 : i32
    %c0_i32_0 = arith.constant 0 : i32
    return %c0_i32 : i32
  }
  func.func @transform_5(%arg0: i32) -> (i32, i32) {
    %c0_i32 = arith.constant 0 : i32
    %c0_i32_0 = arith.constant 0 : i32
    return %c0_i32, %arg0 : i32, i32
  }
}

</mosaic_0001>

<bundles_post_ra>
// kernel: tpu_custom_call.1
= control target key start
LH: loop header
LB: loop body
LE: loop exit
PB: predicated region body
PF: predicated region fallthrough
CT: control target
= control target key end

     0   :  { %10 = vsyncpa [#allocation3], 0  ;;  %s486_s0 = inlined_call_operand.hbm [shape: f32[8,32], index: 0, kind: input, shape index: {}]   ;;  %s487_s1 = inlined_call_operand.vmem [shape: f32[1,8], index: 1, kind: input, shape index: {}]   ;;  %s488_s2 = inlined_call_operand.vmem [shape: f32[1,8], index: 2, kind: input, shape index: {}]   ;;  %s489_s3 = inlined_call_operand.vmem [shape: f32[1,32], index: 3, kind: input, shape index: {}]   ;;  %s490_s4 = inlined_call_operand.vmem [shape: f32[3], index: 4, kind: input, shape index: {}]   ;;  %s491_s5 = inlined_call_operand.hbm [shape: f32[1,8], index: 5, kind: output, shape index: {}]  }
   0x1   :  { %11 = vsyncpa [#allocation5], 0 }
   0x2   :  { %12 = vsyncpa [#allocation4], 0 }
   0x3   :  { %17 = vsyncadd [#allocation3], 1920  ;;  %s389_s18 = smov [#allocation2]   ;;  %s37_s22 = sshll.u32 %s490_s4, 4  ;;  %s38_s22 = int_to_ptr.vmem [resolvable:$true] %s37_s22 }
   0x4   :  { %s18_s19 = sshll.u32 %s389_s18, 4  ;;  %s327_s25 = scalar_lea.hbm %s486_s0, 128  ;;  %s19_s19 = int_to_ptr.vmem [resolvable:$true] %s18_s19 }
   0x5   :  { %p328_p0 = scmp.ne.s32.totalorder %s486_s0, %s327_s25  ;;  %p331_p1 = scmp.lt.u32.totalorder %s327_s25, %s486_s0 }
   0x7   :  { %p333_p2 = pnand %p331_p1, %p328_p0 }
   0x9   :  { %336 = shalt.err (!%p333_p2)
}
   0xa   :  { %s337_s30 = scalar_lea.vmem %s19_s19, 128  ;;  %s341_s6 = scalar_lea.vmem %s19_s19, 2048 }
   0xb   :  { %p338_p3 = scmp.ne.s32.totalorder %s19_s19, %s337_s30  ;;  %p342_p4 = scmp.lt.s32.totalorder %s19_s19, %s19_s19 }
   0xc   :  { %p343_p5 = scmp.lt.s32.totalorder %s341_s6, %s337_s30 }
   0xe   :  { %p344_p6 = por %p343_p5, %p342_p4 }
  0x10   :  { %p345_p7 = pnand %p344_p6, %p338_p3 }
  0x12   :  { %348 = shalt.err (!%p345_p7)
}
  0x13   :  { %s390_s4 = smov 128   ;;  %s391_s7 = smov 8  }
  0x14   :  { %24 = dma.hbm_to_vmem [thread:$0]  %s486_s0, 128, %s19_s19, [#allocation3], %s390_s4, %s390_s4, %s391_s7  }
  0x15   :  { %s349_s10 = scalar_lea.vmem %s38_s22, 16  ;;  %p354_p9 = scmp.lt.s32.totalorder %s38_s22, %s38_s22 }
  0x16   :  { %p350_p8 = scmp.ne.s32.totalorder %s38_s22, %s349_s10  ;;  %p355_p10 = scmp.lt.s32.totalorder %s349_s10, %s349_s10 }
  0x18   :  { %p356_p11 = por %p355_p10, %p354_p9 }
  0x1a   :  { %p357_p12 = pnand %p356_p11, %p350_p8 }
  0x1c   :  { %360 = shalt.err (!%p357_p12)
}
  0x1d   :  { %s392_s11 = smov [#allocation6]  }
  0x1e   :  { %40 = dma.vmem_to_smem %s38_s22, 16, %s392_s11, [#allocation5]  }
  0x1f   :  { %383 = dma.done.wait [#allocation3], 2048  }
  0x20   :  { %384 = vsyncadd [#allocation3], 4294965248 }
  0x21   :  { %385 = dma.done.wait [#allocation5], 16  }
  0x22   :  { %386 = vsyncadd [#allocation5], 4294967280 }
  0x23   :  { %47 = sfence }
  0x24   :  { %v48_v0 = vld [vmem:[#allocation2] sm:$0xff]  ;;  %v49_v1 = vld [vmem:[#allocation2 + $0x8] sm:$0xff]  ;;  %vm72_vm0 = vcmask 261120   ;;  %v393_v2 = vmov 0.0|0.0   ;;  %vm394_vm2 = vmmov 0   ;;  %v395_v5 = vmov 0.0  }
  0x25   :  { %287 = vmatprep.subr.bf16.mxu0 %v393_v2  ;;  %v288_v3 = vpack.c.bf16 %v49_v1, %v48_v0  ;;  %vm444_vm1 = vmpackc.low %vm72_vm0, %vm72_vm0  ;;  %284 = vmatprep.mubr.msk.f32.mxu0 %vm394_vm2, %v395_v5  ;;  %v50_v6 = vld [vmem:[#allocation2 + $0x10] sm:$0xff]  ;;  %v51_v7 = vld [vmem:[#allocation2 + $0x18] sm:$0xff]  ;;  %s67_s13 = sld [smem:[#allocation6]]  ;;  %s216_s14 = sld [smem:[#allocation6 + $0x1]] }
  0x26   :  { %v292_v8 = vpack.c.bf16 %v51_v7, %v50_v6  ;;  %v52_v9 = vld [vmem:[#allocation2 + $0x20] sm:$0xff]  ;;  %v53_v10 = vld [vmem:[#allocation2 + $0x28] sm:$0xff]  ;;  %v54_v12 = vld [vmem:[#allocation2 + $0x30] sm:$0xff]  ;;  %s217_s17 = sld [smem:[#allocation6 + $0x2]] }
  0x27   :  { %290 = vmatpush3.bf16.xpose.msk.msra.mxu0 %vm444_vm1, %v288_v3  ;;  %v296_v11 = vpack.c.bf16 %v53_v10, %v52_v9  ;;  %v55_v13 = vld [vmem:[#allocation2 + $0x38] sm:$0xff]  ;;  %v56_v15 = vld [vmem:[#allocation2 + $0x40] sm:$0xff]  ;;  %v57_v16 = vld [vmem:[#allocation2 + $0x48] sm:$0xff] }
  0x28   :  { %291 = vmatprep.subr.bf16.mxu0 %v393_v2  ;;  %v300_v14 = vpack.c.bf16 %v55_v13, %v54_v12  ;;  %v304_v17 = vpack.c.bf16 %v57_v16, %v56_v15  ;;  %v58_v18 = vld [vmem:[#allocation2 + $0x50] sm:$0xff]  ;;  %v59_v19 = vld [vmem:[#allocation2 + $0x58] sm:$0xff]  ;;  %v60_v21 = vld [vmem:[#allocation2 + $0x60] sm:$0xff] }
  0x29   :  { %v308_v20 = vpack.c.bf16 %v59_v19, %v58_v18  ;;  %v61_v22 = vld [vmem:[#allocation2 + $0x68] sm:$0xff]  ;;  %v62_v24 = vld [vmem:[#allocation2 + $0x70] sm:$0xff]  ;;  %v63_v25 = vld [vmem:[#allocation2 + $0x78] sm:$0xff] }
  0x2a   :  { %v312_v23 = vpack.c.bf16 %v61_v22, %v60_v21  ;;  %v316_v26 = vpack.c.bf16 %v63_v25, %v62_v24  ;;  %v64_v27 = vld [vmem:[%s489_s3] sm:$0x1]  ;;  %s396_s3 = smov [#allocation7]  }
  0x2b   :  { %v65_v28 = vld [vmem:[%s487_s1] sm:$0x1]  ;;  %v70_v29 = vstv %s67_s13  ;;  %v194_v31 = vstv %s216_s14  ;;  %s206_s20 = sshll.u32 %s396_s3, 4  ;;  %s207_s20 = int_to_ptr.vmem [resolvable:$true] %s206_s20 }
  0x2c   :  { %v66_v30 = vld [vmem:[%s488_s2] sm:$0x1]  ;;  %v71_v32 = vmul.f32 %v70_v29, %v65_v28  ;;  %v197_v37 = vstv %s217_s17  ;;  %s361_s1 = scalar_lea.vmem %s207_s20, 16  ;;  %s365_s21 = scalar_lea.vmem %s207_s20, 32 }
  0x2d   :  { %v195_v33 = vmul.f32 %v194_v31, %v66_v30  ;;  %p362_p13 = scmp.ne.s32.totalorder %s207_s20, %s361_s1  ;;  %p366_p0 = scmp.lt.s32.totalorder %s207_s20, %s207_s20 }
  0x2e   :  { %p367_p1 = scmp.lt.s32.totalorder %s365_s21, %s361_s1 }
  0x2f   :  { %294 = vmatpush3.bf16.xpose.msk.msra.mxu0 %vm444_vm1, %v292_v8 }
  0x30   :  { %295 = vmatprep.subr.bf16.mxu0 %v393_v2  ;;  %p368_p2 = por %p367_p1, %p366_p0 }
  0x32   :  { %p369_p3 = pnand %p368_p2, %p362_p13 }
  0x37   :  { %298 = vmatpush3.bf16.xpose.msk.msra.mxu0 %vm444_vm1, %v296_v11 }
  0x38   :  { %299 = vmatprep.subr.bf16.mxu0 %v393_v2 }
  0x3f   :  { %302 = vmatpush3.bf16.xpose.msk.msra.mxu0 %vm444_vm1, %v300_v14 }
  0x40   :  { %303 = vmatprep.subr.bf16.mxu0 %v393_v2 }
  0x47   :  { %306 = vmatpush3.bf16.xpose.msk.msra.mxu0 %vm444_vm1, %v304_v17 }
  0x48   :  { %307 = vmatprep.subr.bf16.mxu0 %v393_v2 }
  0x4f   :  { %310 = vmatpush3.bf16.xpose.msk.msra.mxu0 %vm444_vm1, %v308_v20 }
  0x50   :  { %311 = vmatprep.subr.bf16.mxu0 %v393_v2 }
  0x57   :  { %314 = vmatpush3.bf16.xpose.msk.msra.mxu0 %vm444_vm1, %v312_v23 }
  0x58   :  { %315 = vmatprep.subr.bf16.mxu0 %v393_v2 }
  0x5f   :  { %318 = vmatpush3.bf16.xpose.msk.msra.mxu0 %vm444_vm1, %v316_v26 }
  0x66   :  { %285 = vmatmul.mubr.msk.f32.vlgmr.msra.gmra.mrb[0].mxu0 %vm72_vm0, %v64_v27 }
 0x139   :  { %v190_v34 = vpop.f32.mrb[0].mxu0 }
 0x13a   :  { %v191_v35 = vadd.f32 %v190_v34, %v71_v32  ;;  %v286_v36 = vpop.f32.mrb[1].mxu0 }
 0x13c   :  { %v196_v38 = vadd.f32 %v195_v33, %v191_v35 }
 0x13e   :  { %v198_v39 = vadd.f32 %v197_v37, %v196_v38 }
 0x140   :  { %199 = vst [vmem:[#allocation7] sm:$0x1] %v198_v39 }
 0x141   :  { %372 = shalt.err (!%p369_p3)
}
 0x142   :  { %s373_s23 = scalar_lea.hbm %s491_s5, 16 }
 0x143   :  { %p374_p4 = scmp.ne.s32.totalorder %s491_s5, %s373_s23  ;;  %p377_p5 = scmp.lt.u32.totalorder %s373_s23, %s491_s5 }
 0x145   :  { %p379_p6 = pnand %p377_p5, %p374_p4 }
 0x147   :  { %382 = shalt.err (!%p379_p6)
}
 0x148   :  { %209 = dma.vmem_to_hbm [thread:$0]  %s207_s20, 16, %s491_s5, [#allocation4]  }
 0x149   :  { %387 = dma.done.wait [#allocation4], 16  }
 0x14a   :  { %388 = vsyncadd [#allocation4], 4294967280 }
 0x14b   :  { %213 = vsyncpa [#allocation3], 1 }
 0x14c   :  { %214 = vsyncpa [#allocation4], 1 }
 0x14d   :  { %215 = vsyncpa [#allocation5], 1 }

</bundles_post_ra>
